<compile_context>
chip_gen: v6e
topology: v6e:2x2x1
jax: 0.10.0
libtpu: 0.0.40
codegen_flags: <defaults>
</compile_context>

<pallas_src>
import jax
import jax.numpy as jnp
from jax.experimental import pallas as pl
from jax.experimental.pallas import tpu as pltpu

# ---------------- model hyper-params (small, deterministic) ----------------
VOCAB_SIZE   = 50
EMBED_DIM    = 32
NUM_CLASSES  = 4
KERNEL_SIZES = (3, 4, 5)
NUM_FILTERS  = 8
BATCH        = 2
SEQ_LEN      = 16

K_MAX     = max(KERNEL_SIZES)                      # 5
T_MAX     = SEQ_LEN - min(KERNEL_SIZES) + 1        # 14 (longest valid conv output)
T_PAD     = 16                                     # pad to bf16 sublane tile
KE        = K_MAX * EMBED_DIM                      # 160 (im2col row width)
NF3       = len(KERNEL_SIZES) * NUM_FILTERS        # 24  (all filters, lane-dense)
OUT_LANES = 128                                    # lane-dense output width
BIAS_ROWS = 8                                      # aux rows 0..7: biases (tile-aligned)
AUX_ROWS  = BIAS_ROWS + T_PAD                      # + rows 8..23: validity mask

BATCH_TILE = BATCH                                 # whole batch in one grid step


# ------------------------------- kernel ------------------------------------
def textcnn_kernel(x_ref,      # (Bt, T_PAD, KE)      bf16 im2col block
                   cw_ref,     # (KE, NF3)            bf16 fused, zero-padded conv weights
                   fw_ref,     # (NF3, OUT_LANES)     bf16 fc weights, cols >= C zero
                   aux_ref,    # (AUX_ROWS, OUT_LANES) f32: row0 conv_b, row1 fc_b,
                               #                      rows 8..8+T_PAD-1 = validity mask
                   out_ref):   # (Bt, OUT_LANES)      f32 logits (cols >= C are fc_b pad)
    bt = x_ref.shape[0]

    # All three convs for the whole batch tile in ONE MXU matmul
    # (bf16 operands, f32 accumulation).
    x = x_ref[...].reshape(bt * T_PAD, KE)                               # bf16
    conv = jnp.dot(x, cw_ref[...], preferred_element_type=jnp.float32)   # (bt*T_PAD, NF3)

    conv_b = aux_ref[0:1, :NF3]                                          # (1, NF3)
    act = jnp.maximum(conv + conv_b, 0.0)                                # relu (f32, VPU)

    # Static validity mask: zero out time positions invalid for each filter
    # group (and the 2 padded rows). Post-ReLU values are >= 0, so zeroed
    # rows never win the max.
    mask = aux_ref[BIAS_ROWS:BIAS_ROWS + T_PAD, :NF3]                    # (T_PAD, NF3)
    act = act.reshape(bt, T_PAD, NF3) * mask[None, :, :]

    pooled = jnp.max(act, axis=1)                                        # (bt, NF3)

    # TODO(synk): dropout(0.5) is stochastic in train mode; identity here (eval).

    # Batched bf16 FC, lane-dense (B, 128) result written once.
    fc_b = aux_ref[1:2, :]                                               # (1, OUT_LANES)
    logits = jnp.dot(pooled.astype(jnp.bfloat16), fw_ref[...],
                     preferred_element_type=jnp.float32) + fc_b          # (bt, OUT_LANES)
    out_ref[...] = logits.astype(out_ref.dtype)


# ------------------------------ wrapper ------------------------------------
def _build_im2col(x_tokens, emb_table):
    """im2col[b, t, j*E:(j+1)*E] = embedding[tokens[b, min(t+j, L-1)]].
    Out-of-window taps are neutralized by the zero-padded weight taps (j >= k)
    and the static time-validity mask (t >= SEQ_LEN-k+1) inside the kernel."""
    B, L = x_tokens.shape
    t = jnp.arange(T_PAD)[:, None]
    j = jnp.arange(K_MAX)[None, :]
    win = jnp.minimum(t + j, L - 1)                    # (T_PAD, K_MAX)
    tok = x_tokens[:, win]                             # (B, T_PAD, K_MAX)
    emb = jnp.take(emb_table, tok, axis=0)             # (B, T_PAD, K_MAX, E)
    return emb.reshape(B, T_PAD, KE).astype(jnp.bfloat16)


@jax.jit
def textcnn_forward(x_tokens, emb_table, conv_w_slab, fc_w_slab, aux_slab):
    B = x_tokens.shape[0]
    assert B % BATCH_TILE == 0, "pad the batch to a multiple of BATCH_TILE"
    nb = B // BATCH_TILE

    # TODO(synk): the embedding gather stays an XLA gather under this jit; for
    # large B/SEQ_LEN, DMA the (Bt, SEQ_LEN, E) embedded block instead and build
    # the K_MAX tap shifts in VMEM with pltpu.roll to cut HBM traffic ~5x.
    x_im2col = _build_im2col(x_tokens, emb_table)      # (B, T_PAD, KE) bf16

    out = pl.pallas_call(
        textcnn_kernel,
        out_shape=jax.ShapeDtypeStruct((B, OUT_LANES), jnp.float32),
        grid_spec=pltpu.PrefetchScalarGridSpec(
            num_scalar_prefetch=0,
            grid=(nb,),
            in_specs=[
                pl.BlockSpec((BATCH_TILE, T_PAD, KE), lambda i: (i, 0, 0)),
                pl.BlockSpec((KE, NF3), lambda i: (0, 0)),          # conv weights resident
                pl.BlockSpec((NF3, OUT_LANES), lambda i: (0, 0)),   # fc weights resident
                pl.BlockSpec((AUX_ROWS, OUT_LANES), lambda i: (0, 0)),
            ],
            out_specs=pl.BlockSpec((BATCH_TILE, OUT_LANES), lambda i: (i, 0)),
        ),
        compiler_params=pltpu.CompilerParams(
            # Megacore sharding only pays off with >= 2 substantial batch tiles.
            dimension_semantics=(("parallel",) if nb >= 2 else ("arbitrary",))),
    )(x_im2col, conv_w_slab, fc_w_slab, aux_slab)
    return out[:, :NUM_CLASSES]


# --------------------------- params & packing ------------------------------
def init_params(key):
    """Raw parameters in PyTorch layouts."""
    ks = jax.random.split(key, 9)
    p = {}
    p["embedding"] = (0.1 * jax.random.normal(
        ks[0], (VOCAB_SIZE, EMBED_DIM))).astype(jnp.float32)
    p["conv_w"], p["conv_b"] = [], []
    for i, k in enumerate(KERNEL_SIZES):
        p["conv_w"].append((0.1 * jax.random.normal(
            ks[1 + 2 * i], (NUM_FILTERS, 1, k, EMBED_DIM))).astype(jnp.float32))
        p["conv_b"].append((0.1 * jax.random.normal(
            ks[2 + 2 * i], (NUM_FILTERS,))).astype(jnp.float32))
    p["fc_w"] = (0.1 * jax.random.normal(
        ks[7], (NUM_CLASSES, NF3))).astype(jnp.float32)   # (C, 3F) PyTorch layout
    p["fc_b"] = (0.1 * jax.random.normal(
        ks[8], (NUM_CLASSES,))).astype(jnp.float32)
    return p


def pack_params(raw):
    """Pack conv/fc params into the three kernel slabs (done once)."""
    # Conv weight slab: (K_MAX*E, 3F), taps j >= k zero-padded per group.
    w_slab = jnp.zeros((KE, NF3), jnp.float32)
    for g, k in enumerate(KERNEL_SIZES):
        w = raw["conv_w"][g][:, 0]                     # (F, k, E)
        w = jnp.transpose(w, (1, 2, 0)).reshape(k * EMBED_DIM, NUM_FILTERS)
        w_slab = w_slab.at[:k * EMBED_DIM, g * NUM_FILTERS:(g + 1) * NUM_FILTERS].set(w)

    # FC weight slab: (3F, OUT_LANES), columns >= NUM_CLASSES zero (lane-dense out).
    fw_slab = jnp.zeros((NF3, OUT_LANES), jnp.float32).at[:, :NUM_CLASSES].set(raw["fc_w"].T)

    # Aux slab (f32): row 0 = conv bias, row 1 = fc bias (padded to 128 lanes),
    # rows 8..8+T_PAD-1 = static (T_PAD, NF3) time-validity mask.
    aux = jnp.zeros((AUX_ROWS, OUT_LANES), jnp.float32)
    conv_b = jnp.concatenate(raw["conv_b"], axis=0)    # (3F,)
    aux = aux.at[0, :NF3].set(conv_b)
    aux = aux.at[1, :NUM_CLASSES].set(raw["fc_b"])
    mask = jnp.zeros((T_PAD, NF3), jnp.float32)
    for g, k in enumerate(KERNEL_SIZES):
        mask = mask.at[:SEQ_LEN - k + 1, g * NUM_FILTERS:(g + 1) * NUM_FILTERS].set(1.0)
    aux = aux.at[BIAS_ROWS:BIAS_ROWS + T_PAD, :NF3].set(mask)

    return w_slab.astype(jnp.bfloat16), fw_slab.astype(jnp.bfloat16), aux


# --------------------------- pure-JAX reference -----------------------------
def reference_forward(x_tokens, raw):
    emb = jnp.take(raw["embedding"], x_tokens, axis=0)             # (B, L, E) f32
    feats = []
    for i, k in enumerate(KERNEL_SIZES):
        w = raw["conv_w"][i][:, 0]                                 # (F, k, E)
        b = raw["conv_b"][i]                                       # (F,)
        T = SEQ_LEN - k + 1
        win = jnp.stack([emb[:, t:t + k, :] for t in range(T)], axis=1)  # (B,T,k,E)
        out = jnp.einsum("btje,fje->btf", win, w) + b
        out = jnp.maximum(out, 0.0)
        feats.append(out.max(axis=1))                              # (B, F)
    feat = jnp.concatenate(feats, axis=1)                          # (B, 3F)
    return feat @ raw["fc_w"].T + raw["fc_b"]


# --------------------------------- main -------------------------------------
if __name__ == "__main__":
    key = jax.random.PRNGKey(0)
    pkey, xkey = jax.random.split(key)
    raw = init_params(pkey)
    conv_w_slab, fc_w_slab, aux_slab = pack_params(raw)

    x = jax.random.randint(xkey, (BATCH, SEQ_LEN), 0, VOCAB_SIZE, dtype=jnp.int32)

    out = textcnn_forward(x, raw["embedding"], conv_w_slab, fc_w_slab, aux_slab)
    jax.block_until_ready(out)

    ref = reference_forward(x, raw)
    err = float(jnp.max(jnp.abs(out - ref)))
    assert out.shape == (BATCH, NUM_CLASSES)
    assert err < 3e-2, f"kernel/reference mismatch: max abs err {err}"
    print("KERNEL_OK")
</pallas_src>

<mosaic_0001>
module attributes {stable_mosaic.version = 11 : i64} {
  func.func @textcnn_kernel(%arg0: i32, %arg1: memref<2x16x160xbf16, #tpu.memory_space<vmem>>, %arg2: memref<160x24xbf16, #tpu.memory_space<vmem>>, %arg3: memref<24x128xbf16, #tpu.memory_space<vmem>>, %arg4: memref<24x128xf32, #tpu.memory_space<vmem>>, %arg5: memref<2x128xf32, #tpu.memory_space<vmem>>) attributes {dimension_semantics = [#tpu.dimension_semantics<arbitrary>], iteration_bounds = array<i64: 1>, scalar_prefetch = 0 : i64, scratch_operands = 0 : i64, tpu.core_type = #tpu.core_type<tc>, window_params = [{transform_indices = @transform_0, window_bounds = array<i64: 2, 16, 160>}, {pipeline_mode = #tpu.pipeline_mode<synchronous>, transform_indices = @transform_1, window_bounds = array<i64: 160, 24>}, {pipeline_mode = #tpu.pipeline_mode<synchronous>, transform_indices = @transform_2, window_bounds = array<i64: 24, 128>}, {pipeline_mode = #tpu.pipeline_mode<synchronous>, transform_indices = @transform_3, window_bounds = array<i64: 24, 128>}, {transform_indices = @transform_4, window_bounds = array<i64: 2, 128>}]} {
    %c0 = arith.constant 0 : index
    %c0_0 = arith.constant 0 : index
    %c0_1 = arith.constant 0 : index
    %0 = vector.load %arg1[%c0, %c0_0, %c0_1] : memref<2x16x160xbf16, #tpu.memory_space<vmem>>, vector<2x16x160xbf16>
    %1 = vector.shape_cast %0 : vector<2x16x160xbf16> to vector<32x160xbf16>
    %c0_2 = arith.constant 0 : index
    %c0_3 = arith.constant 0 : index
    %2 = vector.load %arg2[%c0_2, %c0_3] : memref<160x24xbf16, #tpu.memory_space<vmem>>, vector<160x24xbf16>
    %cst = arith.constant dense<0.000000e+00> : vector<32x24xf32>
    %3 = tpu.matmul %1, %2, %cst {dimension_numbers = #tpu.dot_dimension_numbers<[1], [0], [0], [1], [0, 0, 1, 1], [], []>} : vector<32x160xbf16>, vector<160x24xbf16>, vector<32x24xf32> -> vector<32x24xf32>
    %c0_4 = arith.constant 0 : index
    %c0_5 = arith.constant 0 : index
    %4 = vector.load %arg4[%c0_4, %c0_5] : memref<24x128xf32, #tpu.memory_space<vmem>>, vector<1x24xf32>
    %5 = vector.broadcast %4 : vector<1x24xf32> to vector<32x24xf32>
    %6 = arith.addf %3, %5 : vector<32x24xf32>
    %cst_6 = arith.constant 0.000000e+00 : f32
    %7 = vector.broadcast %cst_6 : f32 to vector<32x24xf32>
    %8 = arith.maximumf %6, %7 : vector<32x24xf32>
    %c8 = arith.constant 8 : index
    %c0_7 = arith.constant 0 : index
    %9 = vector.load %arg4[%c8, %c0_7] : memref<24x128xf32, #tpu.memory_space<vmem>>, vector<16x24xf32>
    %10 = vector.shape_cast %8 : vector<32x24xf32> to vector<2x16x24xf32>
    %11 = vector.shape_cast %9 : vector<16x24xf32> to vector<1x16x24xf32>
    %12 = vector.broadcast %11 : vector<1x16x24xf32> to vector<2x16x24xf32>
    %13 = arith.mulf %10, %12 : vector<2x16x24xf32>
    %cst_8 = arith.constant dense<0xFF800000> : vector<2x24xf32>
    %14 = vector.multi_reduction <maximumf>, %13, %cst_8 [1] : vector<2x16x24xf32> to vector<2x24xf32>
    %c1 = arith.constant 1 : index
    %c0_9 = arith.constant 0 : index
    %15 = vector.load %arg4[%c1, %c0_9] : memref<24x128xf32, #tpu.memory_space<vmem>>, vector<1x128xf32>
    %16 = arith.truncf %14 : vector<2x24xf32> to vector<2x24xbf16>
    %c0_10 = arith.constant 0 : index
    %c0_11 = arith.constant 0 : index
    %17 = vector.load %arg3[%c0_10, %c0_11] : memref<24x128xbf16, #tpu.memory_space<vmem>>, vector<24x128xbf16>
    %cst_12 = arith.constant dense<0.000000e+00> : vector<2x128xf32>
    %18 = tpu.matmul %16, %17, %cst_12 {dimension_numbers = #tpu.dot_dimension_numbers<[1], [0], [0], [1], [0, 0, 1, 1], [], []>} : vector<2x24xbf16>, vector<24x128xbf16>, vector<2x128xf32> -> vector<2x128xf32>
    %19 = vector.broadcast %15 : vector<1x128xf32> to vector<2x128xf32>
    %20 = arith.addf %18, %19 : vector<2x128xf32>
    %c0_13 = arith.constant 0 : index
    %c0_14 = arith.constant 0 : index
    %21 = vector.load %arg5[%c0_13, %c0_14] : memref<2x128xf32, #tpu.memory_space<vmem>>, vector<2x128xf32>
    tpu.vector_store %arg5[%c0_13, %c0_14], %20 {strides = array<i32>} : memref<2x128xf32, #tpu.memory_space<vmem>>, vector<2x128xf32>,
    return
  }
  func.func @transform_0(%arg0: i32) -> (i32, i32, i32) {
    %c0_i32 = arith.constant 0 : i32
    %c0_i32_0 = arith.constant 0 : i32
    %c0_i32_1 = arith.constant 0 : i32
    return %arg0, %c0_i32, %c0_i32_0 : i32, i32, i32
  }
  func.func @transform_1(%arg0: i32) -> (i32, i32) {
    %c0_i32 = arith.constant 0 : i32
    %c0_i32_0 = arith.constant 0 : i32
    %c0_i32_1 = arith.constant 0 : i32
    return %c0_i32, %c0_i32_0 : i32, i32
  }
  func.func @transform_2(%arg0: i32) -> (i32, i32) {
    %c0_i32 = arith.constant 0 : i32
    %c0_i32_0 = arith.constant 0 : i32
    %c0_i32_1 = arith.constant 0 : i32
    return %c0_i32, %c0_i32_0 : i32, i32
  }
  func.func @transform_3(%arg0: i32) -> (i32, i32) {
    %c0_i32 = arith.constant 0 : i32
    %c0_i32_0 = arith.constant 0 : i32
    %c0_i32_1 = arith.constant 0 : i32
    return %c0_i32, %c0_i32_0 : i32, i32
  }
  func.func @transform_4(%arg0: i32) -> (i32, i32) {
    %c0_i32 = arith.constant 0 : i32
    %c0_i32_0 = arith.constant 0 : i32
    return %arg0, %c0_i32 : i32, i32
  }
}

</mosaic_0001>

<bundles_post_ra>
// kernel: textcnn_forward.1
= control target key start
LH: loop header
LB: loop body
LE: loop exit
PB: predicated region body
PF: predicated region fallthrough
CT: control target
= control target key end

     0   :  { %v375_v1 = vmov 0   ;;  %vm126_vm0 = vcmask 261120   ;;  %s474_s0 = inlined_call_operand.vmem [shape: bf16[2,16,160], index: 0, kind: input, shape index: {}]   ;;  %s475_s1 = inlined_call_operand.vmem [shape: bf16[160,24], index: 1, kind: input, shape index: {}]   ;;  %s476_s2 = inlined_call_operand.vmem [shape: bf16[24,128], index: 2, kind: input, shape index: {}]   ;;  %s477_s3 = inlined_call_operand.vmem [shape: f32[24,128], index: 3, kind: input, shape index: {}]   ;;  %s478_s4 = inlined_call_operand.hbm [shape: f32[2,128], index: 4, kind: output, shape index: {}]  }
   0x1   :  { %v335_v0 = vld [vmem:[%s475_s1 + $0x38] sm:$0xff]   ;;  %133 = vmatprep.subr.bf16.mxu0 %v375_v1  ;;  %v336_v2 = vld [vmem:[%s475_s1 + $0x30] sm:$0xff]   ;;  %v337_v3 = vld [vmem:[%s475_s1 + $0x28] sm:$0xff]  }
   0x2   :  { %134 = vmatpush1.bf16.msra.mxu0 %v335_v0  ;;  %v338_v4 = vld [vmem:[%s475_s1 + $0x20] sm:$0xff]   ;;  %v339_v6 = vld [vmem:[%s475_s1 + $0x18] sm:$0xff]  }
   0x3   :  { %135 = vmatprep.subr.bf16.mxu0 %v375_v1  ;;  %v347_v5 = vld [vmem:[%s474_s0 + $0x4] ss:$8 sps:$4 sm:$0xff]  }
   0x4   :  { %314 = vmatprep.mubr.msk.bf16.mxu0 %vm126_vm0, %v347_v5 }
   0x6   :  { %136 = vmatpush1.bf16.msra.mxu0 %v336_v2 }
   0x7   :  { %137 = vmatprep.subr.bf16.mxu0 %v375_v1 }
   0xa   :  { %138 = vmatpush1.bf16.msra.mxu0 %v337_v3 }
   0xb   :  { %139 = vmatprep.subr.bf16.mxu0 %v375_v1 }
   0xe   :  { %140 = vmatpush1.bf16.msra.mxu0 %v338_v4 }
   0xf   :  { %9 = vsyncpa [#allocation3], 0  ;;  %141 = vmatprep.subr.bf16.mxu0 %v375_v1  ;;  %v340_v7 = vld [vmem:[%s475_s1 + $0x10] sm:$0xff]   ;;  %v341_v8 = vld [vmem:[%s475_s1 + $0x8] sm:$0xff]   ;;  %vm240_vm1 = vcmask 1043456   ;;  %v376_v16 = vmov 0.0  }
  0x10   :  { %v342_v9 = vld [vmem:[%s475_s1] sm:$0xff]   ;;  %v343_v10 = vld [vmem:[%s475_s1 + $0x48] sm:$0xff]   ;;  %v348_v13 = vld [vmem:[%s474_s0 + $0x14] ss:$8 sps:$4 sm:$0xff]   ;;  %323 = vmatprep.subr.bf16.mxu1 %v376_v16  ;;  %vm377_vm2 = vmmov 0   ;;  %vm192_vm3 = vcmask 195584  }
  0x11   :  { %v344_v11 = vld [vmem:[%s475_s1 + $0x40] sm:$0xff]   ;;  %v350_v14 = vld [vmem:[%s474_s0 + $0x10] ss:$8 sps:$4 sm:$0xff]   ;;  %v351_v15 = vld [vmem:[%s476_s2 + $0x8] ss:$0 sps:$4 sm:$0xff]   ;;  %327 = vmatprep.mubr.msk.bf16.mxu1 %vm377_vm2, %v376_v16  ;;  %vm225_vm4 = vcmask 1041409  }
  0x12   :  { %142 = vmatpush1.bf16.msra.mxu0 %v339_v6  ;;  %v345_v12 = vld [vmem:[%s474_s0] ss:$8 sps:$4 sm:$0xff]   ;;  %v242_v17 = vsel %vm240_vm1, %v351_v15, 0  ;;  %v187_v27 = vld [vmem:[%s477_s3 + $0x10] sm:$0xff]  ;;  %s378_s26 = smov [#allocation2]  }
  0x13   :  { %143 = vmatprep.subr.bf16.mxu0 %v375_v1  ;;  %324 = vmatpush3.bf16.msra.mxu1 %v242_v17  ;;  %v352_v18 = vld [vmem:[%s476_s2] sm:$0xff]   ;;  %v186_v24 = vld [vmem:[%s477_s3 + $0x8] sm:$0xff]  ;;  %s291_s27 = sshll.u32 %s378_s26, 4  ;;  %s292_s27 = int_to_ptr.vmem [resolvable:$true] %s291_s27 }
  0x14   :  { %325 = vmatprep.subr.bf16.mxu1 %v376_v16  ;;  %v299_v19 = vld [vmem:[%s477_s3] ss:$0 sm:$0xff]  ;;  %v316_v2 = vld [vmem:[%s477_s3 + $0x1] ss:$0 sm:$0xff]  ;;  %s353_s28 = scalar_lea.vmem %s292_s27, 32  ;;  %p358_p1 = scmp.lt.s32.totalorder %s292_s27, %s292_s27 }
  0x15   :  { %p354_p0 = scmp.ne.s32.totalorder %s292_s27, %s353_s28  ;;  %p359_p2 = scmp.lt.s32.totalorder %s353_s28, %s353_s28 }
  0x16   :  { %144 = vmatpush1.bf16.msra.mxu0 %v340_v7 }
  0x17   :  { %145 = vmatprep.subr.bf16.mxu0 %v375_v1  ;;  %326 = vmatpush3.bf16.msra.mxu1 %v352_v18  ;;  %p360_p3 = por %p359_p2, %p358_p1 }
  0x19   :  { %p361_p4 = pnand %p360_p3, %p354_p0 }
  0x1a   :  { %146 = vmatpush1.bf16.msra.mxu0 %v341_v8 }
  0x1b   :  { %147 = vmatprep.subr.bf16.mxu0 %v375_v1 }
  0x1e   :  { %148 = vmatpush1.bf16.msra.mxu0 %v342_v9 }
  0x1f   :  { %161 = vmatprep.subr.bf16.mxu0 %v375_v1 }
  0x22   :  { %162 = vmatpush2.bf16.msra.mxu0 %v343_v10 }
  0x23   :  { %163 = vmatprep.subr.bf16.mxu0 %v375_v1 }
  0x26   :  { %164 = vmatpush2.bf16.msra.mxu0 %v344_v11 }
  0x29   :  { %166 = vmatmul.mubr.bf16.vlgmr.msra.gmra.mxu0 %v345_v12 }
  0x2a   :  { %315 = vmatprep.mubr.msk.bf16.mxu0 %vm126_vm0, %v348_v13 }
  0x31   :  { %174 = vmatmul.mubr.bf16.gmra.mxu0 %v350_v14 }
  0xe9   :  { %v167_v20 = vpop.f32.mrf.mxu0 }
  0xea   :  { %v168_v21 = vadd.f32 %v299_v19, %v167_v20 }
  0xeb   :  { %v169_v22 = vpop.f32.mrf.mxu0 }
  0xec   :  { %v182_v23 = vmax.f32 %v168_v21, 0.0 }
  0xed   :  { %v170_v25 = vpop.f32.mrf.mxu0 }
  0xee   :  { %v171_v26 = vadd.f32 %v299_v19, %v170_v25  ;;  %v188_v29 = vmul.f32 %v186_v24, %v182_v23 }
  0xef   :  { %v172_v28 = vpop.f32.mrf.mxu0 }
  0xf0   :  { %v183_v30 = vmax.f32 %v171_v26, 0.0  ;;  %v193_v35 = vsel %vm192_vm3, %v188_v29, -inf }
  0xf1   :  { %v175_v31 = vpop.f32.mrf.mxu0 }
  0xf2   :  { %v189_v32 = vmul.f32 %v187_v27, %v183_v30  ;;  %v176_v33 = vadd.f32 %v299_v19, %v175_v31 }
  0xf3   :  { %v177_v34 = vpop.f32.mrf.mxu0 }
  0xf4   :  { %v194_v36 = vsel %vm192_vm3, %v189_v32, -inf  ;;  %v184_v37 = vmax.f32 %v176_v33, 0.0 }
  0xf5   :  { %v195_v38 = vmax.f32 %v193_v35, %v194_v36  ;;  %v178_v39 = vpop.f32.mrf.mxu0 }
  0xf6   :  { %v179_v40 = vadd.f32 %v299_v19, %v178_v39  ;;  %v190_v43 = vmul.f32 %v186_v24, %v184_v37 }
  0xf7   :  { %v196_v41 = vrot.slane %v195_v38, 4  ;;  %v180_v42 = vpop.f32.mrf.mxu0 }
  0xf8   :  { %v185_v44 = vmax.f32 %v179_v40, 0.0  ;;  %v202_v48 = vsel %vm192_vm3, %v190_v43, -inf }
  0xf9   :  { %v197_v45 = vmax.f32 %v195_v38, %v196_v41 }
  0xfa   :  { %v191_v46 = vmul.f32 %v187_v27, %v185_v44 }
  0xfb   :  { %v198_v47 = vrot.slane %v197_v45, 2 }
  0xfc   :  { %v203_v49 = vsel %vm192_vm3, %v191_v46, -inf }
  0xfd   :  { %v199_v50 = vmax.f32 %v197_v45, %v198_v47  ;;  %v204_v51 = vmax.f32 %v202_v48, %v203_v49 }
  0xff   :  { %v205_v52 = vrot.slane %v204_v51, 4  ;;  %v200_v53 = vrot.slane %v199_v50, 1 }
 0x101   :  { %v206_v54 = vmax.f32 %v204_v51, %v205_v52  ;;  %v201_v56 = vmax.f32 %v199_v50, %v200_v53 }
 0x103   :  { %v207_v55 = vrot.slane %v206_v54, 2  ;;  %v212_v59 = vpack.c.bf16 %v201_v56, %v201_v56 }
 0x105   :  { %v208_v57 = vmax.f32 %v206_v54, %v207_v55  ;;  %v223_v62 = vunpack.c.l.b16 %v212_v59 }
 0x107   :  { %v209_v58 = vrot.slane %v208_v57, 1 }
 0x109   :  { %v210_v60 = vmax.f32 %v208_v57, %v209_v58 }
 0x10b   :  { %v213_v61 = vpack.c.bf16 %v210_v60, %v210_v60 }
 0x10d   :  { %v224_v63 = vunpack.c.l.b16 %v213_v61 }
 0x10f   :  { %v226_v0 = vsel %vm225_vm4, %v224_v63, %v223_v62 }
 0x110   :  { %v227_v1 = vpack.c.b16 %v226_v0, %v226_v0 }
 0x112   :  { %328 = vmatmul.mubr.msk.bf16.vlgmr.msra.gmra.mxu1 %vm192_vm3, %v227_v1 }
 0x1d2   :  { %v278_v3 = vpop.f32.mrf.mxu1 }
 0x1d3   :  { %v279_v4 = vadd.f32 %v316_v2, %v278_v3 }
 0x1d4   :  { %v329_v5 = vpop.f32.mrf.mxu1 }
 0x1d5   :  { %284 = vst [vmem:[#allocation2] sm:$0x3] %v279_v4 }
 0x1d6   :  { %v281_v6 = vpop.f32.mrf.mxu1 }
 0x1d7   :  { %364 = shalt.err (!%p361_p4)
}
 0x1d8   :  { %294 = dma.vmem_to_hbm [thread:$0]  %s292_s27, 32, %s478_s4, [#allocation3]   ;;  %v330_v7 = vpop.f32.mrf.mxu1 }
 0x1d9   :  { %373 = dma.done.wait [#allocation3], 32  }
 0x1da   :  { %374 = vsyncadd [#allocation3], 4294967264 }
 0x1db   :  { %298 = vsyncpa [#allocation3], 1 }

</bundles_post_ra>
